<compile_context>
chip_gen: v5e
topology: v5e:2x2
jax: 0.10.0
libtpu: 0.0.40
codegen_flags: <defaults>
</compile_context>

<pallas_src>
import functools

import jax
import jax.numpy as jnp
from jax.experimental import pallas as pl
from jax.experimental.pallas import tpu as pltpu


# ---------------------------------------------------------------------------
# Helpers
# ---------------------------------------------------------------------------
def _round_up(n, m):
    return ((n + m - 1) // m) * m


# ---------------------------------------------------------------------------
# Fused decoder kernel: chained  h = act(h @ W_i + b_i)  for all layers,
# intermediates stay resident in vregs/VMEM (one batch tile per grid step).
#   refs = (x_ref, w0_ref, b0_ref, w1_ref, b1_ref, ..., o_ref)
#   acts = static tuple of bools (apply ReLU after layer i?)
# Weights are bf16; accumulation / bias / ReLU are f32.
# ---------------------------------------------------------------------------
def _decoder_fused_kernel(*refs, acts):
    x_ref = refs[0]
    o_ref = refs[-1]
    h = x_ref[...]                                   # f32 (TB, F_in)
    for i, act in enumerate(acts):
        w_ref = refs[1 + 2 * i]                      # bf16 (F_in_p, F_out_p)
        b_ref = refs[2 + 2 * i]                      # f32  (1, F_out_p)
        h = jnp.dot(h.astype(w_ref.dtype), w_ref[...],
                    preferred_element_type=jnp.float32) + b_ref[...]
        if act:
            h = jnp.maximum(h, 0.0)                  # ReLU on the f32 accumulator
    o_ref[...] = h.astype(o_ref.dtype)


def decoder_forward(fused_params, x, *, batch_tile=512):
    """Run the fused decoder.  fused_params: list of (W_bf16, b_f32, apply_act).

    x: (B, latent_size) f32, consumed at its natural shape (no wrapper pad).
    Returns (B, n_meta_feat) f32 (no wrapper slice).
    """
    B, F = x.shape
    Fout = fused_params[-1][1].shape[1]              # n_meta_feat (unpadded final N)

    # Batch tiling: one full-dim block at small B, (TB, F) tiles at large B.
    # A partial trailing tile is safe: padded batch rows only produce garbage in
    # rows whose output store is masked (each row is independent).
    TB = B if B <= batch_tile else batch_tile
    grid = (pl.cdiv(B, TB),)

    flat_inputs = [x]
    acts = []
    in_specs = [pl.BlockSpec((TB, F), lambda i: (i, 0),
                             memory_space=pltpu.MemorySpace.VMEM)]
    for w, b, act in fused_params:
        flat_inputs.append(w)
        flat_inputs.append(b)
        acts.append(act)
        # Constant index_map: weights/biases DMA'd once, VMEM-resident across grid.
        in_specs.append(pl.BlockSpec(w.shape, lambda i: (0, 0),
                                     memory_space=pltpu.MemorySpace.VMEM))
        in_specs.append(pl.BlockSpec(b.shape, lambda i: (0, 0),
                                     memory_space=pltpu.MemorySpace.VMEM))
    out_specs = pl.BlockSpec((TB, Fout), lambda i: (i, 0),
                             memory_space=pltpu.MemorySpace.VMEM)

    kernel = functools.partial(_decoder_fused_kernel, acts=tuple(acts))
    out = pl.pallas_call(
        kernel,
        grid=grid,
        in_specs=in_specs,
        out_specs=out_specs,
        out_shape=jax.ShapeDtypeStruct((B, Fout), jnp.float32),
        compiler_params=pltpu.CompilerParams(
            dimension_semantics=("parallel",)),      # megacore / dual-TC sharding
    )(*flat_inputs)
    return out


# ---------------------------------------------------------------------------
# Parameter construction (raw, matching the PyTorch module) + BN fold + pad.
# ---------------------------------------------------------------------------
def init_decoder_params(key, latent_size, n_meta_feat, features, eps=1e-5):
    """features is already reversed (as in Decoder.__init__).

    Returns (raw_layers, fused_params):
      raw_layers   : per-layer dict(scale, shift, w, b, act)  -- f32 reference
      fused_params : per-layer (W_folded_padded_bf16, b_folded_padded_f32, act)
    """
    raw_layers = []
    in_dims = [latent_size] + features[:-1]
    for fin, fout in zip(in_dims, features):
        key, kw, kg, kb, km, kv = jax.random.split(key, 6)
        w = jax.random.normal(kw, (fin, fout), jnp.float32) * (1.0 / jnp.sqrt(fin))
        gamma = 1.0 + 0.1 * jax.random.normal(kg, (fin,), jnp.float32)
        beta = 0.1 * jax.random.normal(kb, (fin,), jnp.float32)
        rmean = 0.1 * jax.random.normal(km, (fin,), jnp.float32)
        rvar = 1.0 + 0.1 * jax.random.uniform(kv, (fin,), jnp.float32)
        inv_std = 1.0 / jnp.sqrt(rvar + eps)
        scale = (gamma * inv_std).reshape(1, fin)                  # eval-mode BN affine
        shift = (beta - rmean * gamma * inv_std).reshape(1, fin)
        bias = jnp.zeros((1, fout), jnp.float32)                   # Linear(bias=False)
        raw_layers.append(dict(scale=scale, shift=shift, w=w, b=bias, act=True))

    # final layer: no BN, bias=True, no activation
    key, kw, kb = jax.random.split(key, 3)
    fin = features[-1]
    w = jax.random.normal(kw, (fin, n_meta_feat), jnp.float32) * (1.0 / jnp.sqrt(fin))
    b = 0.1 * jax.random.normal(kb, (1, n_meta_feat), jnp.float32)
    raw_layers.append(dict(scale=jnp.ones((1, fin), jnp.float32),
                           shift=jnp.zeros((1, fin), jnp.float32),
                           w=w, b=b, act=False))

    # Fold BN into W/b.  Pad only the *hidden* feature dims to 128 lanes:
    #   - layer 0 K dim stays = latent_size so x needs no wrapper pad,
    #   - final layer N dim stays = n_meta_feat so the output needs no slice,
    #   - each layer's K padding matches the previous layer's N padding.
    # Weights are cast to bf16 once here (halves weight DMA, native MXU dtype);
    # biases stay f32 (added to the f32 accumulator).
    fused_params = []
    n_layers = len(raw_layers)
    prev_width = latent_size
    for idx, layer in enumerate(raw_layers):
        w_f = layer["scale"].reshape(-1, 1) * layer["w"]           # diag(scale) @ W
        b_f = layer["b"] + layer["shift"] @ layer["w"]             # shift @ W + b
        fin, fout = w_f.shape
        is_last = idx == n_layers - 1
        fin_p = prev_width                                         # match incoming h width
        fout_p = fout if is_last else _round_up(fout, 128)
        w_p = jnp.zeros((fin_p, fout_p), jnp.float32).at[:fin, :fout].set(w_f)
        b_p = jnp.zeros((1, fout_p), jnp.float32).at[:, :fout].set(b_f)
        fused_params.append((w_p.astype(jnp.bfloat16), b_p, layer["act"]))
        prev_width = fout_p
    return raw_layers, fused_params


# ---------------------------------------------------------------------------
# References
# ---------------------------------------------------------------------------
def decoder_forward_ref(raw_layers, x):
    """Pure-JAX f32 reference with the un-folded (BN affine -> Linear) formulation."""
    h = x
    for layer in raw_layers:
        h = (h * layer["scale"] + layer["shift"]) @ layer["w"] + layer["b"]
        if layer["act"]:
            h = jnp.maximum(h, 0.0)
    return h


def decoder_forward_fused_ref(fused_params, x):
    """Pure-JAX replica of the kernel math (folded bf16 weights, f32 accum)."""
    h = x
    for w, b, act in fused_params:
        h = jnp.dot(h.astype(w.dtype), w, preferred_element_type=jnp.float32) + b
        if act:
            h = jnp.maximum(h, 0.0)
    return h


if __name__ == "__main__":
    latent_size = 32
    n_meta_feat = 16
    features_reversed = [64, 128]   # params.features.copy(); reversed in __init__
    batch = 8

    key = jax.random.PRNGKey(0)
    kparam, kx = jax.random.split(key)
    raw_layers, fused_params = init_decoder_params(
        kparam, latent_size, n_meta_feat, features_reversed)
    x = jax.random.normal(kx, (batch, latent_size), jnp.float32)

    out = decoder_forward(fused_params, x)
    out = jax.block_until_ready(out)
    assert out.shape == (batch, n_meta_feat)

    # Kernel vs. identical-math JAX reference (tight: same bf16 weights, f32 accum).
    ref_fused = decoder_forward_fused_ref(fused_params, x)
    assert jnp.allclose(out, ref_fused, atol=1e-3, rtol=1e-3), "kernel vs fused-JAX mismatch"

    # Kernel vs. true f32 module semantics (loose: bf16 weight quantization).
    ref = decoder_forward_ref(raw_layers, x)
    assert jnp.allclose(out, ref, atol=3e-2, rtol=3e-2), "mismatch vs f32 reference"

    print("KERNEL_OK")
</pallas_src>

<mosaic_0001>
module attributes {stable_mosaic.version = 11 : i64} {
  func.func @_decoder_fused_kernel(%arg0: i32, %arg1: memref<8x32xf32, #tpu.memory_space<vmem>>, %arg2: memref<32x128xbf16, #tpu.memory_space<vmem>>, %arg3: memref<1x128xf32, #tpu.memory_space<vmem>>, %arg4: memref<128x128xbf16, #tpu.memory_space<vmem>>, %arg5: memref<1x128xf32, #tpu.memory_space<vmem>>, %arg6: memref<128x16xbf16, #tpu.memory_space<vmem>>, %arg7: memref<1x16xf32, #tpu.memory_space<vmem>>, %arg8: memref<8x16xf32, #tpu.memory_space<vmem>>) attributes {dimension_semantics = [#tpu.dimension_semantics<parallel>], iteration_bounds = array<i64: 1>, scalar_prefetch = 0 : i64, scratch_operands = 0 : i64, tpu.core_type = #tpu.core_type<tc>, window_params = [{transform_indices = @transform_0, window_bounds = array<i64: 8, 32>}, {pipeline_mode = #tpu.pipeline_mode<synchronous>, transform_indices = @transform_1, window_bounds = array<i64: 32, 128>}, {pipeline_mode = #tpu.pipeline_mode<synchronous>, transform_indices = @transform_2, window_bounds = array<i64: 1, 128>}, {pipeline_mode = #tpu.pipeline_mode<synchronous>, transform_indices = @transform_3, window_bounds = array<i64: 128, 128>}, {pipeline_mode = #tpu.pipeline_mode<synchronous>, transform_indices = @transform_4, window_bounds = array<i64: 1, 128>}, {pipeline_mode = #tpu.pipeline_mode<synchronous>, transform_indices = @transform_5, window_bounds = array<i64: 128, 16>}, {pipeline_mode = #tpu.pipeline_mode<synchronous>, transform_indices = @transform_6, window_bounds = array<i64: 1, 16>}, {transform_indices = @transform_7, window_bounds = array<i64: 8, 16>}]} {
    %c0 = arith.constant 0 : index
    %c0_0 = arith.constant 0 : index
    %0 = vector.load %arg1[%c0, %c0_0] : memref<8x32xf32, #tpu.memory_space<vmem>>, vector<8x32xf32>
    %1 = arith.truncf %0 : vector<8x32xf32> to vector<8x32xbf16>
    %c0_1 = arith.constant 0 : index
    %c0_2 = arith.constant 0 : index
    %2 = vector.load %arg2[%c0_1, %c0_2] : memref<32x128xbf16, #tpu.memory_space<vmem>>, vector<32x128xbf16>
    %cst = arith.constant dense<0.000000e+00> : vector<8x128xf32>
    %3 = tpu.matmul %1, %2, %cst {dimension_numbers = #tpu.dot_dimension_numbers<[1], [0], [0], [1], [0, 0, 1, 1], [], []>} : vector<8x32xbf16>, vector<32x128xbf16>, vector<8x128xf32> -> vector<8x128xf32>
    %c0_3 = arith.constant 0 : index
    %c0_4 = arith.constant 0 : index
    %4 = vector.load %arg3[%c0_3, %c0_4] : memref<1x128xf32, #tpu.memory_space<vmem>>, vector<1x128xf32>
    %5 = vector.broadcast %4 : vector<1x128xf32> to vector<8x128xf32>
    %6 = arith.addf %3, %5 : vector<8x128xf32>
    %cst_5 = arith.constant 0.000000e+00 : f32
    %7 = vector.broadcast %cst_5 : f32 to vector<8x128xf32>
    %8 = arith.maximumf %6, %7 : vector<8x128xf32>
    %9 = arith.truncf %8 : vector<8x128xf32> to vector<8x128xbf16>
    %c0_6 = arith.constant 0 : index
    %c0_7 = arith.constant 0 : index
    %10 = vector.load %arg4[%c0_6, %c0_7] : memref<128x128xbf16, #tpu.memory_space<vmem>>, vector<128x128xbf16>
    %cst_8 = arith.constant dense<0.000000e+00> : vector<8x128xf32>
    %11 = tpu.matmul %9, %10, %cst_8 {dimension_numbers = #tpu.dot_dimension_numbers<[1], [0], [0], [1], [0, 0, 1, 1], [], []>} : vector<8x128xbf16>, vector<128x128xbf16>, vector<8x128xf32> -> vector<8x128xf32>
    %c0_9 = arith.constant 0 : index
    %c0_10 = arith.constant 0 : index
    %12 = vector.load %arg5[%c0_9, %c0_10] : memref<1x128xf32, #tpu.memory_space<vmem>>, vector<1x128xf32>
    %13 = vector.broadcast %12 : vector<1x128xf32> to vector<8x128xf32>
    %14 = arith.addf %11, %13 : vector<8x128xf32>
    %cst_11 = arith.constant 0.000000e+00 : f32
    %15 = vector.broadcast %cst_11 : f32 to vector<8x128xf32>
    %16 = arith.maximumf %14, %15 : vector<8x128xf32>
    %17 = arith.truncf %16 : vector<8x128xf32> to vector<8x128xbf16>
    %c0_12 = arith.constant 0 : index
    %c0_13 = arith.constant 0 : index
    %18 = vector.load %arg6[%c0_12, %c0_13] : memref<128x16xbf16, #tpu.memory_space<vmem>>, vector<128x16xbf16>
    %cst_14 = arith.constant dense<0.000000e+00> : vector<8x16xf32>
    %19 = tpu.matmul %17, %18, %cst_14 {dimension_numbers = #tpu.dot_dimension_numbers<[1], [0], [0], [1], [0, 0, 1, 1], [], []>} : vector<8x128xbf16>, vector<128x16xbf16>, vector<8x16xf32> -> vector<8x16xf32>
    %c0_15 = arith.constant 0 : index
    %c0_16 = arith.constant 0 : index
    %20 = vector.load %arg7[%c0_15, %c0_16] : memref<1x16xf32, #tpu.memory_space<vmem>>, vector<1x16xf32>
    %21 = vector.broadcast %20 : vector<1x16xf32> to vector<8x16xf32>
    %22 = arith.addf %19, %21 : vector<8x16xf32>
    %c0_17 = arith.constant 0 : index
    %c0_18 = arith.constant 0 : index
    %23 = vector.load %arg8[%c0_17, %c0_18] : memref<8x16xf32, #tpu.memory_space<vmem>>, vector<8x16xf32>
    tpu.vector_store %arg8[%c0_17, %c0_18], %22 {strides = array<i32>} : memref<8x16xf32, #tpu.memory_space<vmem>>, vector<8x16xf32>,
    return
  }
  func.func @transform_0(%arg0: i32) -> (i32, i32) {
    %c0_i32 = arith.constant 0 : i32
    %c0_i32_0 = arith.constant 0 : i32
    return %arg0, %c0_i32 : i32, i32
  }
  func.func @transform_1(%arg0: i32) -> (i32, i32) {
    %c0_i32 = arith.constant 0 : i32
    %c0_i32_0 = arith.constant 0 : i32
    %c0_i32_1 = arith.constant 0 : i32
    return %c0_i32, %c0_i32_0 : i32, i32
  }
  func.func @transform_2(%arg0: i32) -> (i32, i32) {
    %c0_i32 = arith.constant 0 : i32
    %c0_i32_0 = arith.constant 0 : i32
    %c0_i32_1 = arith.constant 0 : i32
    return %c0_i32, %c0_i32_0 : i32, i32
  }
  func.func @transform_3(%arg0: i32) -> (i32, i32) {
    %c0_i32 = arith.constant 0 : i32
    %c0_i32_0 = arith.constant 0 : i32
    %c0_i32_1 = arith.constant 0 : i32
    return %c0_i32, %c0_i32_0 : i32, i32
  }
  func.func @transform_4(%arg0: i32) -> (i32, i32) {
    %c0_i32 = arith.constant 0 : i32
    %c0_i32_0 = arith.constant 0 : i32
    %c0_i32_1 = arith.constant 0 : i32
    return %c0_i32, %c0_i32_0 : i32, i32
  }
  func.func @transform_5(%arg0: i32) -> (i32, i32) {
    %c0_i32 = arith.constant 0 : i32
    %c0_i32_0 = arith.constant 0 : i32
    %c0_i32_1 = arith.constant 0 : i32
    return %c0_i32, %c0_i32_0 : i32, i32
  }
  func.func @transform_6(%arg0: i32) -> (i32, i32) {
    %c0_i32 = arith.constant 0 : i32
    %c0_i32_0 = arith.constant 0 : i32
    %c0_i32_1 = arith.constant 0 : i32
    return %c0_i32, %c0_i32_0 : i32, i32
  }
  func.func @transform_7(%arg0: i32) -> (i32, i32) {
    %c0_i32 = arith.constant 0 : i32
    %c0_i32_0 = arith.constant 0 : i32
    return %arg0, %c0_i32 : i32, i32
  }
}

</mosaic_0001>

<bundles_post_ra>
// kernel: tpu_custom_call.1
= control target key start
LH: loop header
LB: loop body
LE: loop exit
PB: predicated region body
PF: predicated region fallthrough
CT: control target
= control target key end

     0   :  { %12 = vsyncpa [#allocation3], 0  ;;  %s528_s0 = inlined_call_operand.vmem [shape: f32[8,32], index: 0, kind: input, shape index: {}]   ;;  %s529_s1 = inlined_call_operand.hbm [shape: bf16[32,128], index: 1, kind: input, shape index: {}]   ;;  %s530_s2 = inlined_call_operand.vmem [shape: f32[1,128], index: 2, kind: input, shape index: {}]   ;;  %s531_s3 = inlined_call_operand.vmem [shape: bf16[128,128], index: 3, kind: input, shape index: {}]   ;;  %s532_s4 = inlined_call_operand.vmem [shape: f32[1,128], index: 4, kind: input, shape index: {}]   ;;  %s533_s5 = inlined_call_operand.vmem [shape: bf16[128,16], index: 5, kind: input, shape index: {}]   ;;  %s534_s6 = inlined_call_operand.vmem [shape: f32[1,16], index: 6, kind: input, shape index: {}]   ;;  %s535_s7 = inlined_call_operand.hbm [shape: f32[8,16], index: 7, kind: output, shape index: {}]  }
   0x1   :  { %13 = vsyncpa [#allocation4], 0  ;;  %s20_s26 = sshll.u32 %s529_s1, 4  ;;  %s418_s27 = smov [#allocation2]   ;;  %s21_s26 = int_to_ptr.hbm [resolvable:$true] %s20_s26 }
   0x2   :  { %s22_s28 = sshll.u32 %s418_s27, 4  ;;  %s419_s29 = smov 64   ;;  %s23_s28 = int_to_ptr.vmem [resolvable:$true] %s22_s28 }
   0x3   :  { %s420_s30 = smov 4  }
   0x4   :  { %28 = dma.hbm_to_vmem [thread:$0]  %s21_s26, 256, %s23_s28, [#allocation3], %s419_s29, %s419_s29, %s420_s30  }
   0x5   :  { %414 = dma.done.wait [#allocation3], 256  }
   0x6   :  { %415 = vsyncadd [#allocation3], 4294967040  ;;  %v342_v0 = vld [vmem:[#allocation2 + $0x8] sm:$0xff]  ;;  %v350_v1 = vld [vmem:[%s531_s3 + $0x38] sm:$0xff]  ;;  %vm66_vm0 = vcmask 261120   ;;  %s421_s19 = smov [#allocation5]  }
   0x7   :  { %76 = vmatpush.bf16.msra.mxu0 %v342_v0  ;;  %v341_v2 = vld [vmem:[#allocation2] sm:$0xff]  ;;  %153 = vmatpush.bf16.msra.mxu1 %v350_v1  ;;  %v349_v4 = vld [vmem:[%s531_s3 + $0x30] sm:$0xff]  ;;  %v348_v6 = vld [vmem:[%s531_s3 + $0x28] sm:$0xff]  ;;  %s256_s20 = sshll.u32 %s421_s19, 4  ;;  %vm249_vm1 = vcmask 130048   ;;  %s257_s20 = int_to_ptr.vmem [resolvable:$true] %s256_s20 }
   0x8   :  { %v44_v3 = vld [vmem:[%s528_s0] sm:$0xff]  ;;  %v346_v8 = vld [vmem:[%s531_s3 + $0x18] sm:$0xff]  ;;  %v345_v9 = vld [vmem:[%s531_s3 + $0x10] sm:$0xff] }
   0x9   :  { %v45_v5 = vpack.c.bf16 %v44_v3, %v44_v3  ;;  %v347_v7 = vld [vmem:[%s531_s3 + $0x20] sm:$0xff]  ;;  %v344_v10 = vld [vmem:[%s531_s3 + $0x8] sm:$0xff]  ;;  %v358_v12 = vld [vmem:[%s533_s5 + $0x38] sm:$0xff] }
   0xa   :  { %v343_v11 = vld [vmem:[%s531_s3] sm:$0xff]  ;;  %236 = vmatpush.bf16.msra.mxu2 %v358_v12  ;;  %v357_v13 = vld [vmem:[%s533_s5 + $0x30] sm:$0xff]  ;;  %v356_v14 = vld [vmem:[%s533_s5 + $0x28] sm:$0xff] }
   0xb   :  { %77 = vmatpush.bf16.msra.mxu0 %v341_v2  ;;  %154 = vmatpush.bf16.msra.mxu1 %v349_v4  ;;  %v355_v15 = vld [vmem:[%s533_s5 + $0x20] sm:$0xff]  ;;  %v354_v16 = vld [vmem:[%s533_s5 + $0x18] sm:$0xff]  ;;  %v353_v17 = vld [vmem:[%s533_s5 + $0x10] sm:$0xff] }
   0xc   :  { %v363_v18 = vld [vmem:[%s530_s2] ss:$0 sm:$0xff]  ;;  %v352_v24 = vld [vmem:[%s533_s5 + $0x8] sm:$0xff] }
   0xd   :  { %v351_v25 = vld [vmem:[%s533_s5] sm:$0xff]  ;;  %s258_s5 = sshll.u32 %s535_s7, 4  ;;  %s259_s5 = int_to_ptr.hbm [resolvable:$true] %s258_s5 }
   0xe   :  { %276 = vmatmul.msk.bf16.vlgmr.msra.gmra.mxu0 %vm66_vm0, %v45_v5  ;;  %237 = vmatpush.bf16.msra.mxu2 %v357_v13  ;;  %v364_v26 = vld [vmem:[%s532_s4] ss:$0 sm:$0xff] }
   0xf   :  { %155 = vmatpush.bf16.msra.mxu1 %v348_v6  ;;  %v365_v32 = vld [vmem:[%s534_s6] ss:$0 sm:$0xff] }
  0x12   :  { %238 = vmatpush.bf16.msra.mxu2 %v356_v14 }
  0x13   :  { %156 = vmatpush.bf16.msra.mxu1 %v347_v7 }
  0x16   :  { %239 = vmatpush.bf16.msra.mxu2 %v355_v15 }
  0x17   :  { %157 = vmatpush.bf16.msra.mxu1 %v346_v8 }
  0x1a   :  { %240 = vmatpush.bf16.msra.mxu2 %v354_v16 }
  0x1b   :  { %158 = vmatpush.bf16.msra.mxu1 %v345_v9 }
  0x1e   :  { %241 = vmatpush.bf16.msra.mxu2 %v353_v17 }
  0x1f   :  { %159 = vmatpush.bf16.msra.mxu1 %v344_v10 }
  0x22   :  { %242 = vmatpush.bf16.msra.mxu2 %v352_v24 }
  0x23   :  { %160 = vmatpush.bf16.msra.mxu1 %v343_v11 }
  0x26   :  { %243 = vmatpush.bf16.msra.mxu2 %v351_v25 }
  0x8b   :  { %v79_v19 = vpop.f32.mrf.mxu0 }
  0x8c   :  { %v80_v20 = vadd.f32 %v363_v18, %v79_v19 }
  0x8e   :  { %v83_v21 = vmax.f32 %v80_v20, 0.0 }
  0x90   :  { %v84_v22 = vpack.c.bf16 %v83_v21, %v83_v21 }
  0x92   :  { %161 = vmatmul.bf16.vlgmr.msra.gmra.mxu1 %v84_v22 }
  0x93   :  { %v81_v23 = vpop.f32.mrf.mxu0 }
 0x10f   :  { %v162_v27 = vpop.f32.mrf.mxu1 }
 0x110   :  { %v163_v28 = vadd.f32 %v364_v26, %v162_v27 }
 0x112   :  { %v166_v29 = vmax.f32 %v163_v28, 0.0 }
 0x114   :  { %v167_v30 = vpack.c.bf16 %v166_v29, %v166_v29 }
 0x116   :  { %244 = vmatmul.bf16.vlgmr.msra.gmra.mxu2 %v167_v30 }
 0x117   :  { %v164_v31 = vpop.f32.mrf.mxu1 }
 0x199   :  { %v245_v33 = vpop.f32.mrf.mxu2 }
 0x19a   :  { %v246_v34 = vadd.f32 %v365_v32, %v245_v33 }
 0x19c   :  { %250 = vst.msk [vmem:[#allocation5] sm:$0xff] %vm249_vm1, %v246_v34 }
 0x19d   :  { %261 = dma.vmem_to_hbm [thread:$0]  %s257_s20, 128, %s259_s5, [#allocation4]  }
 0x1a1   :  { %v247_v35 = vpop.f32.mrf.mxu2 }
 0x1a2   :  { %416 = dma.done.wait [#allocation4], 128  }
 0x1a3   :  { %417 = vsyncadd [#allocation4], 4294967168 }
 0x1a4   :  { %266 = vsyncpa [#allocation3], 1 }
 0x1a5   :  { %267 = vsyncpa [#allocation4], 1 }

</bundles_post_ra>
